<compile_context>
chip_gen: v5e
topology: v5e:2x2
jax: 0.10.0
libtpu: 0.0.40
codegen_flags: <defaults>
</compile_context>

<pallas_src>
import jax
import jax.numpy as jnp
from jax import lax
from jax.experimental import pallas as pl
from jax.experimental.pallas import tpu as pltpu


_VMEM_LIMIT = 64 * 1024 * 1024  # <= physical VMEM on v5e/v6e/v7x, >= all defaults


def _round_up(x, m):
    return (x + m - 1) // m * m


def _pick_chunk(n, pref):
    """Largest divisor of n that is <= pref (time-chunk / tile picker)."""
    c = max(1, min(pref, n))
    while n % c:
        c -= 1
    return c


def _pick_batch_tile(b):
    """Split the batch into 2 aligned tiles when large (v7x TC sharding)."""
    if b >= 256 and b % 16 == 0:
        return b // 2
    return b


def _pick_row_tile(n, pref=512):
    """Row tile for the head matmul: divides round_up(n, 8), prefers 512."""
    np8 = _round_up(n, 8)
    for tm in sorted({pref, 512, 256, 128, 64, 32, 16, 8}, reverse=True):
        if tm <= np8 and np8 % tm == 0:
            return tm, np8
    return np8, np8


# ----------------------------------------------------------------------------
# Fused GRU layer kernel: per time-chunk input projection + in-chunk recurrence.
# gi already contains  x@W_ih + b_ih + [b_hh_r, b_hh_z, 0] ; only b_hn is
# applied inside the r*(...) term.  PyTorch gate order (r, z, n):
#   r = sigmoid(gi_r + h@Whh_r)
#   z = sigmoid(gi_z + h@Whh_z)
#   n = tanh  (gi_n + r * (h@Whh_n + b_hn))
#   h' = n + z*(h - n)   ==  (1-z)*n + z*h
# ----------------------------------------------------------------------------
def gru_layer_kernel(x_ref, h0_ref, wih_ref, whh_ref, bgi_ref, bhn_ref,
                     y_ref, hT_ref, h_scr, gi_scr):
    s_idx = pl.program_id(1)                       # time-chunk index ("arbitrary")
    Ts, Tb, Din = x_ref.shape
    H = h0_ref.shape[-1]

    @pl.when(s_idx == 0)
    def _():
        h_scr[...] = h0_ref[...].astype(jnp.float32)

    # Fused, lane-dense input projection for the whole chunk (one MXU matmul).
    x_flat = x_ref[...].reshape(Ts * Tb, Din)
    gi = jnp.dot(x_flat, wih_ref[...],
                 preferred_element_type=jnp.float32) + bgi_ref[...]
    gi_scr[...] = gi.reshape(Ts, Tb, 3 * H).astype(gi_scr.dtype)

    w_hh = whh_ref[...]          # resident in VMEM across the whole grid
    b_hn = bhn_ref[...]          # (1, H) f32, broadcasts over rows

    # TODO(synk): for production H that is a multiple of 128 the gate slices
    # below are lane-aligned, zero-cost views; small demo H is not.
    def step(t, h):
        gi_t = gi_scr[t].astype(jnp.float32)                       # (Tb, 3H)
        gh = jnp.dot(h.astype(w_hh.dtype), w_hh,
                     preferred_element_type=jnp.float32)           # (Tb, 3H)
        # sigmoid(x) == 0.5*(1+tanh(0.5*x)): one EUP issue instead of exp+div.
        r = 0.5 * (1.0 + jnp.tanh(0.5 * (gi_t[:, :H] + gh[:, :H])))
        z = 0.5 * (1.0 + jnp.tanh(0.5 * (gi_t[:, H:2 * H] + gh[:, H:2 * H])))
        n = jnp.tanh(gi_t[:, 2 * H:] + r * (gh[:, 2 * H:] + b_hn))
        h_new = n + z * (h - n)
        y_ref[t] = h_new.astype(y_ref.dtype)
        return h_new

    h_final = lax.fori_loop(0, Ts, step, h_scr[...])
    h_scr[...] = h_final                       # carry across time chunks (f32)
    hT_ref[...] = h_final                      # resident output, flushed at end


def gru_layer(x_tm, h0, lp, *, time_chunk=16):
    """x_tm: (S, B, Din) time-major (compute dtype), h0: (B, H) f32.
    lp: prepared layer params {w_ih (Din,3H), w_hh (H,3H), b_gi (1,3H), b_hn (1,H)}.
    Returns y (S,B,H) in compute dtype and h_T (B,H) f32."""
    S, B, Din = x_tm.shape
    H = h0.shape[-1]
    cdt = lp["w_ih"].dtype
    isz = jnp.dtype(cdt).itemsize

    Ts = _pick_chunk(S, time_chunk)            # sweep per (B, H) / VMEM budget
    Tb = _pick_batch_tile(B)
    nb, ns = B // Tb, S // Ts

    # TODO(synk): mark resident weight blocks pipeline_mode=pl.Buffered(1) once
    # single-buffered constant blocks are vetted on the target jax version.
    return pl.pallas_call(
        gru_layer_kernel,
        out_shape=(jax.ShapeDtypeStruct((S, B, H), cdt),
                   jax.ShapeDtypeStruct((B, H), jnp.float32)),
        grid_spec=pltpu.PrefetchScalarGridSpec(
            num_scalar_prefetch=0,
            grid=(nb, ns),
            in_specs=[
                pl.BlockSpec((Ts, Tb, Din), lambda b, s: (s, b, 0)),   # x chunk
                pl.BlockSpec((Tb, H), lambda b, s: (b, 0)),            # h0 tile
                pl.BlockSpec((Din, 3 * H), lambda b, s: (0, 0)),       # W_ih resident
                pl.BlockSpec((H, 3 * H), lambda b, s: (0, 0)),         # W_hh resident
                pl.BlockSpec((1, 3 * H), lambda b, s: (0, 0)),         # folded b_gi
                pl.BlockSpec((1, H), lambda b, s: (0, 0)),             # b_hn
            ],
            out_specs=[
                pl.BlockSpec((Ts, Tb, H), lambda b, s: (s, b, 0)),     # y chunk
                pl.BlockSpec((Tb, H), lambda b, s: (b, 0)),            # h_T (resident over s)
            ],
            scratch_shapes=[
                pltpu.VMEM((Tb, H), jnp.float32),        # carried hidden state (f32)
                pltpu.VMEM((Ts, Tb, 3 * H), cdt),        # per-chunk gi
            ],
        ),
        compiler_params=pltpu.CompilerParams(
            dimension_semantics=("parallel", "arbitrary"),
            vmem_limit_bytes=_VMEM_LIMIT),
        cost_estimate=pl.CostEstimate(
            flops=2 * S * B * (Din + H) * 3 * H + 12 * S * B * H,
            transcendentals=3 * S * B * H,
            bytes_accessed=isz * (S * B * Din + S * B * H
                                  + (Din + H) * 3 * H)
                           + 4 * (4 * H + 2 * B * H)),
    )(x_tm, h0, lp["w_ih"], lp["w_hh"], lp["b_gi"], lp["b_hn"])


# ----------------------------------------------------------------------------
# Lane-dense matmul + bias kernel: fused vocab + critic head.
# Rows tiled ("parallel"); weight / bias are constant-index resident blocks.
# ----------------------------------------------------------------------------
def matmul_bias_kernel(x_ref, w_ref, b_ref, o_ref):
    o_ref[...] = (jnp.dot(x_ref[...], w_ref[...],
                          preferred_element_type=jnp.float32)
                  + b_ref[...]).astype(o_ref.dtype)


def matmul_bias(x, w, b, *, tile_m=512):
    """x: (N, K) compute dtype, w: (K, C) compute dtype, b: (1, C) f32 -> (N, C) f32."""
    N, K = x.shape
    C = w.shape[1]
    tm, Np = _pick_row_tile(N, tile_m)
    if Np != N:                                  # only when N % 8 != 0 (tiny pad)
        x = jnp.pad(x, ((0, Np - N), (0, 0)))
    out = pl.pallas_call(
        matmul_bias_kernel,
        out_shape=jax.ShapeDtypeStruct((Np, C), jnp.float32),
        grid_spec=pltpu.PrefetchScalarGridSpec(
            num_scalar_prefetch=0,
            grid=(Np // tm,),
            in_specs=[pl.BlockSpec((tm, K), lambda i: (i, 0)),    # row tile of x
                      pl.BlockSpec((K, C), lambda i: (0, 0)),     # resident weight
                      pl.BlockSpec((1, C), lambda i: (0, 0))],    # resident bias
            out_specs=pl.BlockSpec((tm, C), lambda i: (i, 0)),
        ),
        compiler_params=pltpu.CompilerParams(
            dimension_semantics=("parallel",),
            vmem_limit_bytes=_VMEM_LIMIT),
        cost_estimate=pl.CostEstimate(
            flops=2 * Np * K * C,
            transcendentals=0,
            bytes_accessed=x.dtype.itemsize * (Np * K + K * C)
                           + 4 * (C + Np * C)),
    )(x, w, b)
    return out[:N] if Np != N else out


# ----------------------------------------------------------------------------
# One-time parameter preparation (hoisted out of the forward pass).
# ----------------------------------------------------------------------------
def prepare_params(params, compute_dtype=jnp.bfloat16):
    H = params["gru"][0]["w_hh"].shape[0]
    V = params["w_out"].shape[1]
    Cp = _round_up(V + 1, 128)                  # critic folded in as column V
    w_head = jnp.pad(
        jnp.concatenate([params["w_out"], params["w_crit"]], axis=1),
        ((0, 0), (0, Cp - (V + 1)))).astype(compute_dtype)
    b_head = jnp.pad(
        jnp.concatenate([params["b_out"], params["b_crit"]], axis=1),
        ((0, 0), (0, Cp - (V + 1)))).astype(jnp.float32)
    gru = []
    for p in params["gru"]:
        # Fold b_ih plus the r/z parts of b_hh into the projection bias.
        b_gi = (p["b_ih"] + jnp.concatenate(
            [p["b_hh"][:, :2 * H], jnp.zeros((1, H), jnp.float32)], axis=1)
                ).astype(jnp.float32)
        gru.append({
            "w_ih": p["w_ih"].astype(compute_dtype),
            "w_hh": p["w_hh"].astype(compute_dtype),
            "b_gi": b_gi,
            "b_hn": p["b_hh"][:, 2 * H:].astype(jnp.float32),
        })
    return {
        "embedding": params["embedding"].astype(compute_dtype),
        "w_head": w_head, "b_head": b_head,
        "gru": gru, "layer_size": H, "voc_size": V,
    }


# ----------------------------------------------------------------------------
# Full RNNCritic forward.
# ----------------------------------------------------------------------------
def rnn_critic_forward(prepared, tokens, hidden_state=None):
    """tokens: (batch, seq) int32.
    Returns (logits (B,S,V) f32, critic (B,S) f32, hidden (L,B,H) f32)."""
    B, S = tokens.shape
    L = len(prepared["gru"])
    H = prepared["layer_size"]
    V = prepared["voc_size"]

    if hidden_state is None:
        hidden_state = jnp.zeros((L, B, H), jnp.float32)

    # Time-major embedding gather: transpose the tiny int token matrix, not
    # the embedded activations (no full-activation transposes between layers).
    x_tm = jnp.take(prepared["embedding"], tokens.T, axis=0)       # (S, B, E)

    h_outs = []
    layer_in = x_tm
    for l in range(L):
        y, hT = gru_layer(layer_in, hidden_state[l], prepared["gru"][l])
        h_outs.append(hT)
        layer_in = y                                               # (S, B, H) time-major
    hidden_out = jnp.stack(h_outs, axis=0)                         # (L, B, H) f32

    # TODO(synk): layer_normalization branch not implemented (default False in smiles_rnn).

    head_out = matmul_bias(layer_in.reshape(S * B, H),
                           prepared["w_head"], prepared["b_head"])  # (S*B, Cp) f32
    logits = jnp.transpose(head_out[:, :V].reshape(S, B, V), (1, 0, 2))   # (B, S, V)
    critic = head_out[:, V].reshape(S, B).T                               # (B, S)
    return logits, critic, hidden_out


# ----------------------------------------------------------------------------
# Pure-JAX reference (correctness check), f32 end-to-end.
# ----------------------------------------------------------------------------
def reference_forward(params, tokens):
    B, S = tokens.shape
    num_layers = len(params["gru"])
    H = params["gru"][0]["w_hh"].shape[0]
    emb = jnp.take(params["embedding"], tokens, axis=0)
    x = jnp.transpose(emb, (1, 0, 2))
    h_outs = []
    for l in range(num_layers):
        p = params["gru"][l]
        h = jnp.zeros((B, H), jnp.float32)
        ys = []
        for t in range(S):
            gi = x[t] @ p["w_ih"] + p["b_ih"]
            gh = h @ p["w_hh"] + p["b_hh"]
            i_r, i_z, i_n = gi[:, :H], gi[:, H:2 * H], gi[:, 2 * H:]
            h_r, h_z, h_n = gh[:, :H], gh[:, H:2 * H], gh[:, 2 * H:]
            r = jax.nn.sigmoid(i_r + h_r)
            z = jax.nn.sigmoid(i_z + h_z)
            n = jnp.tanh(i_n + r * h_n)
            h = (1.0 - z) * n + z * h
            ys.append(h)
        x = jnp.stack(ys, axis=0)
        h_outs.append(h)
    out_flat = jnp.transpose(x, (1, 0, 2)).reshape(-1, H)
    logits = (out_flat @ params["w_out"] + params["b_out"]).reshape(B, S, -1)
    critic = (out_flat @ params["w_crit"] + params["b_crit"]).reshape(B, -1)
    return logits, critic, jnp.stack(h_outs, axis=0)


# ----------------------------------------------------------------------------
# Deterministic synthetic parameters (no checkpoint).
# ----------------------------------------------------------------------------
def make_params(voc_size, emb_size, layer_size, num_layers, key):
    keys = jax.random.split(key, 4 + 4 * num_layers)
    ki = iter(keys)
    params = {
        "embedding": 0.1 * jax.random.normal(next(ki), (voc_size, emb_size), jnp.float32),
        "w_out": 0.1 * jax.random.normal(next(ki), (layer_size, voc_size), jnp.float32),
        "b_out": 0.1 * jax.random.normal(next(ki), (1, voc_size), jnp.float32),
        "w_crit": 0.1 * jax.random.normal(next(ki), (layer_size, 1), jnp.float32),
        "b_crit": jnp.zeros((1, 1), jnp.float32),
        "gru": [],
    }
    for l in range(num_layers):
        din = emb_size if l == 0 else layer_size
        params["gru"].append({
            "w_ih": 0.1 * jax.random.normal(next(ki), (din, 3 * layer_size), jnp.float32),
            "w_hh": 0.1 * jax.random.normal(next(ki), (layer_size, 3 * layer_size), jnp.float32),
            "b_ih": 0.1 * jax.random.normal(next(ki), (1, 3 * layer_size), jnp.float32),
            "b_hh": 0.1 * jax.random.normal(next(ki), (1, 3 * layer_size), jnp.float32),
        })
    return params


if __name__ == "__main__":
    # Small config consistent with RNNCritic / smiles_rnn RNN.
    batch, seq = 2, 8
    voc_size, emb_size, layer_size, num_layers = 16, 32, 32, 2

    key = jax.random.PRNGKey(0)
    k_param, k_tok = jax.random.split(key)
    params = make_params(voc_size, emb_size, layer_size, num_layers, k_param)
    tokens = jax.random.randint(k_tok, (batch, seq), 0, voc_size, dtype=jnp.int32)

    r_logits, r_critic, r_hidden = reference_forward(params, tokens)

    # --- Strict check: f32 compute path matches the module semantics exactly.
    prep_f32 = prepare_params(params, compute_dtype=jnp.float32)
    logits, critic, hidden_out = rnn_critic_forward(prep_f32, tokens)
    jax.block_until_ready((logits, critic, hidden_out))

    assert logits.shape == (batch, seq, voc_size)
    assert critic.shape == (batch, seq)
    assert hidden_out.shape == (num_layers, batch, layer_size)
    assert jnp.allclose(logits, r_logits, atol=1e-4, rtol=1e-4)
    assert jnp.allclose(critic, r_critic, atol=1e-4, rtol=1e-4)
    assert jnp.allclose(hidden_out, r_hidden, atol=1e-4, rtol=1e-4)

    # --- Fast path: bf16 MXU operands, f32 state/gates. Loose sanity check.
    prep_bf16 = prepare_params(params, compute_dtype=jnp.bfloat16)
    logits_b, critic_b, hidden_b = rnn_critic_forward(prep_bf16, tokens)
    jax.block_until_ready((logits_b, critic_b, hidden_b))

    assert logits_b.shape == (batch, seq, voc_size)
    assert critic_b.shape == (batch, seq)
    assert hidden_b.shape == (num_layers, batch, layer_size)
    assert jnp.allclose(logits_b, r_logits, atol=2.5e-2, rtol=2.5e-2)
    assert jnp.allclose(critic_b, r_critic, atol=2.5e-2, rtol=2.5e-2)
    assert jnp.allclose(hidden_b, r_hidden, atol=2.5e-2, rtol=2.5e-2)

    print("KERNEL_OK")
</pallas_src>

<mosaic_0001>
module attributes {stable_mosaic.version = 11 : i64} {
  func.func @gru_layer_kernel(%arg0: i32, %arg1: i32, %arg2: memref<8x2x32xf32, #tpu.memory_space<vmem>>, %arg3: memref<2x32xf32, #tpu.memory_space<vmem>>, %arg4: memref<32x96xf32, #tpu.memory_space<vmem>>, %arg5: memref<32x96xf32, #tpu.memory_space<vmem>>, %arg6: memref<1x96xf32, #tpu.memory_space<vmem>>, %arg7: memref<1x32xf32, #tpu.memory_space<vmem>>, %arg8: memref<8x2x32xf32, #tpu.memory_space<vmem>>, %arg9: memref<2x32xf32, #tpu.memory_space<vmem>>, %arg10: memref<2x32xf32, #tpu.memory_space<vmem>>, %arg11: memref<8x2x96xf32, #tpu.memory_space<vmem>>) attributes {dimension_semantics = [#tpu.dimension_semantics<parallel>, #tpu.dimension_semantics<arbitrary>], iteration_bounds = array<i64: 1, 1>, scalar_prefetch = 0 : i64, scratch_operands = 2 : i64, tpu.core_type = #tpu.core_type<tc>, window_params = [{transform_indices = @transform_0, window_bounds = array<i64: 8, 2, 32>}, {transform_indices = @transform_1, window_bounds = array<i64: 2, 32>}, {pipeline_mode = #tpu.pipeline_mode<synchronous>, transform_indices = @transform_2, window_bounds = array<i64: 32, 96>}, {pipeline_mode = #tpu.pipeline_mode<synchronous>, transform_indices = @transform_3, window_bounds = array<i64: 32, 96>}, {pipeline_mode = #tpu.pipeline_mode<synchronous>, transform_indices = @transform_4, window_bounds = array<i64: 1, 96>}, {pipeline_mode = #tpu.pipeline_mode<synchronous>, transform_indices = @transform_5, window_bounds = array<i64: 1, 32>}, {transform_indices = @transform_6, window_bounds = array<i64: 8, 2, 32>}, {transform_indices = @transform_7, window_bounds = array<i64: 2, 32>}]} {
    %c0_i32 = arith.constant 0 : i32
    %0 = arith.cmpi eq, %arg1, %c0_i32 : i32
    %1 = arith.extui %0 : i1 to i32
    %c0_i32_0 = arith.constant 0 : i32
    %2 = arith.cmpi ne, %1, %c0_i32_0 : i32
    scf.if %2 {
      %c0_22 = arith.constant 0 : index
      %c0_23 = arith.constant 0 : index
      %19 = vector.load %arg3[%c0_22, %c0_23] : memref<2x32xf32, #tpu.memory_space<vmem>>, vector<2x32xf32>
      %c0_24 = arith.constant 0 : index
      %c0_25 = arith.constant 0 : index
      %20 = vector.load %arg10[%c0_24, %c0_25] : memref<2x32xf32, #tpu.memory_space<vmem>>, vector<2x32xf32>
      tpu.vector_store %arg10[%c0_24, %c0_25], %19 {strides = array<i32>} : memref<2x32xf32, #tpu.memory_space<vmem>>, vector<2x32xf32>,
    } else {
    }
    %c0 = arith.constant 0 : index
    %c0_1 = arith.constant 0 : index
    %c0_2 = arith.constant 0 : index
    %3 = vector.load %arg2[%c0, %c0_1, %c0_2] : memref<8x2x32xf32, #tpu.memory_space<vmem>>, vector<8x2x32xf32>
    %4 = vector.shape_cast %3 : vector<8x2x32xf32> to vector<16x32xf32>
    %c0_3 = arith.constant 0 : index
    %c0_4 = arith.constant 0 : index
    %5 = vector.load %arg4[%c0_3, %c0_4] : memref<32x96xf32, #tpu.memory_space<vmem>>, vector<32x96xf32>
    %cst = arith.constant dense<0.000000e+00> : vector<16x96xf32>
    %6 = tpu.matmul %4, %5, %cst {dimension_numbers = #tpu.dot_dimension_numbers<[1], [0], [0], [1], [0, 0, 1, 1], [], []>} : vector<16x32xf32>, vector<32x96xf32>, vector<16x96xf32> -> vector<16x96xf32>
    %c0_5 = arith.constant 0 : index
    %c0_6 = arith.constant 0 : index
    %7 = vector.load %arg6[%c0_5, %c0_6] : memref<1x96xf32, #tpu.memory_space<vmem>>, vector<1x96xf32>
    %8 = vector.broadcast %7 : vector<1x96xf32> to vector<16x96xf32>
    %9 = arith.addf %6, %8 : vector<16x96xf32>
    %10 = vector.shape_cast %9 : vector<16x96xf32> to vector<8x2x96xf32>
    %c0_7 = arith.constant 0 : index
    %c0_8 = arith.constant 0 : index
    %c0_9 = arith.constant 0 : index
    %11 = vector.load %arg11[%c0_7, %c0_8, %c0_9] : memref<8x2x96xf32, #tpu.memory_space<vmem>>, vector<8x2x96xf32>
    tpu.vector_store %arg11[%c0_7, %c0_8, %c0_9], %10 {strides = array<i32>} : memref<8x2x96xf32, #tpu.memory_space<vmem>>, vector<8x2x96xf32>,
    %c0_10 = arith.constant 0 : index
    %c0_11 = arith.constant 0 : index
    %12 = vector.load %arg5[%c0_10, %c0_11] : memref<32x96xf32, #tpu.memory_space<vmem>>, vector<32x96xf32>
    %c0_12 = arith.constant 0 : index
    %c0_13 = arith.constant 0 : index
    %13 = vector.load %arg7[%c0_12, %c0_13] : memref<1x32xf32, #tpu.memory_space<vmem>>, vector<1x32xf32>
    %c0_14 = arith.constant 0 : index
    %c0_15 = arith.constant 0 : index
    %14 = vector.load %arg10[%c0_14, %c0_15] : memref<2x32xf32, #tpu.memory_space<vmem>>, vector<2x32xf32>
    %c0_i32_16 = arith.constant 0 : i32
    %c8_i32 = arith.constant 8 : i32
    %15 = arith.addi %c0_i32_16, %c8_i32 : i32
    %c1_i32 = arith.constant 1 : i32
    %16 = scf.for %arg12 = %c0_i32_16 to %15 step %c1_i32 iter_args(%arg13 = %14) -> (vector<2x32xf32>)  : i32 {
      %19 = arith.index_cast %arg12 : i32 to index
      %c0_22 = arith.constant 0 : index
      %c0_23 = arith.constant 0 : index
      %20 = vector.load %arg11[%19, %c0_22, %c0_23] : memref<8x2x96xf32, #tpu.memory_space<vmem>>, vector<1x2x96xf32>
      %21 = vector.shape_cast %20 : vector<1x2x96xf32> to vector<2x96xf32>
      %cst_24 = arith.constant dense<0.000000e+00> : vector<2x96xf32>
      %22 = tpu.matmul %arg13, %12, %cst_24 {dimension_numbers = #tpu.dot_dimension_numbers<[1], [0], [0], [1], [0, 0, 1, 1], [], []>} : vector<2x32xf32>, vector<32x96xf32>, vector<2x96xf32> -> vector<2x96xf32>
      %23 = vector.extract_strided_slice %21 {offsets = [0, 0], sizes = [2, 32], strides = [1, 1]} : vector<2x96xf32> to vector<2x32xf32>
      %24 = vector.extract_strided_slice %22 {offsets = [0, 0], sizes = [2, 32], strides = [1, 1]} : vector<2x96xf32> to vector<2x32xf32>
      %25 = arith.addf %23, %24 : vector<2x32xf32>
      %cst_25 = arith.constant 5.000000e-01 : f32
      %26 = vector.broadcast %cst_25 : f32 to vector<2x32xf32>
      %27 = arith.mulf %26, %25 : vector<2x32xf32>
      %28 = math.tanh %27 : vector<2x32xf32>
      %cst_26 = arith.constant 1.000000e+00 : f32
      %29 = vector.broadcast %cst_26 : f32 to vector<2x32xf32>
      %30 = arith.addf %29, %28 : vector<2x32xf32>
      %cst_27 = arith.constant 5.000000e-01 : f32
      %31 = vector.broadcast %cst_27 : f32 to vector<2x32xf32>
      %32 = arith.mulf %31, %30 : vector<2x32xf32>
      %33 = vector.extract_strided_slice %21 {offsets = [0, 32], sizes = [2, 32], strides = [1, 1]} : vector<2x96xf32> to vector<2x32xf32>
      %34 = vector.extract_strided_slice %22 {offsets = [0, 32], sizes = [2, 32], strides = [1, 1]} : vector<2x96xf32> to vector<2x32xf32>
      %35 = arith.addf %33, %34 : vector<2x32xf32>
      %cst_28 = arith.constant 5.000000e-01 : f32
      %36 = vector.broadcast %cst_28 : f32 to vector<2x32xf32>
      %37 = arith.mulf %36, %35 : vector<2x32xf32>
      %38 = math.tanh %37 : vector<2x32xf32>
      %cst_29 = arith.constant 1.000000e+00 : f32
      %39 = vector.broadcast %cst_29 : f32 to vector<2x32xf32>
      %40 = arith.addf %39, %38 : vector<2x32xf32>
      %cst_30 = arith.constant 5.000000e-01 : f32
      %41 = vector.broadcast %cst_30 : f32 to vector<2x32xf32>
      %42 = arith.mulf %41, %40 : vector<2x32xf32>
      %43 = vector.extract_strided_slice %21 {offsets = [0, 64], sizes = [2, 32], strides = [1, 1]} : vector<2x96xf32> to vector<2x32xf32>
      %44 = vector.extract_strided_slice %22 {offsets = [0, 64], sizes = [2, 32], strides = [1, 1]} : vector<2x96xf32> to vector<2x32xf32>
      %45 = vector.broadcast %13 : vector<1x32xf32> to vector<2x32xf32>
      %46 = arith.addf %44, %45 : vector<2x32xf32>
      %47 = arith.mulf %32, %46 : vector<2x32xf32>
      %48 = arith.addf %43, %47 : vector<2x32xf32>
      %49 = math.tanh %48 : vector<2x32xf32>
      %50 = arith.subf %arg13, %49 : vector<2x32xf32>
      %51 = arith.mulf %42, %50 : vector<2x32xf32>
      %52 = arith.addf %49, %51 : vector<2x32xf32>
      %53 = arith.index_cast %arg12 : i32 to index
      %c0_31 = arith.constant 0 : index
      %c0_32 = arith.constant 0 : index
      %54 = vector.load %arg8[%53, %c0_31, %c0_32] : memref<8x2x32xf32, #tpu.memory_space<vmem>>, vector<1x2x32xf32>
      %55 = vector.shape_cast %54 : vector<1x2x32xf32> to vector<2x32xf32>
      %56 = vector.shape_cast %52 : vector<2x32xf32> to vector<1x2x32xf32>
      tpu.vector_store %arg8[%53, %c0_31, %c0_32], %56 {strides = array<i32>} : memref<8x2x32xf32, #tpu.memory_space<vmem>>, vector<1x2x32xf32>,
      scf.yield %52 : vector<2x32xf32>
    }
    %c8_i32_17 = arith.constant 8 : i32
    %c0_18 = arith.constant 0 : index
    %c0_19 = arith.constant 0 : index
    %17 = vector.load %arg10[%c0_18, %c0_19] : memref<2x32xf32, #tpu.memory_space<vmem>>, vector<2x32xf32>
    tpu.vector_store %arg10[%c0_18, %c0_19], %16 {strides = array<i32>} : memref<2x32xf32, #tpu.memory_space<vmem>>, vector<2x32xf32>,
    %c0_20 = arith.constant 0 : index
    %c0_21 = arith.constant 0 : index
    %18 = vector.load %arg9[%c0_20, %c0_21] : memref<2x32xf32, #tpu.memory_space<vmem>>, vector<2x32xf32>
    tpu.vector_store %arg9[%c0_20, %c0_21], %16 {strides = array<i32>} : memref<2x32xf32, #tpu.memory_space<vmem>>, vector<2x32xf32>,
    return
  }
  func.func @transform_0(%arg0: i32, %arg1: i32) -> (i32, i32, i32) {
    %c0_i32 = arith.constant 0 : i32
    %c0_i32_0 = arith.constant 0 : i32
    return %arg1, %arg0, %c0_i32 : i32, i32, i32
  }
  func.func @transform_1(%arg0: i32, %arg1: i32) -> (i32, i32) {
    %c0_i32 = arith.constant 0 : i32
    %c0_i32_0 = arith.constant 0 : i32
    return %arg0, %c0_i32 : i32, i32
  }
  func.func @transform_2(%arg0: i32, %arg1: i32) -> (i32, i32) {
    %c0_i32 = arith.constant 0 : i32
    %c0_i32_0 = arith.constant 0 : i32
    %c0_i32_1 = arith.constant 0 : i32
    return %c0_i32, %c0_i32_0 : i32, i32
  }
  func.func @transform_3(%arg0: i32, %arg1: i32) -> (i32, i32) {
    %c0_i32 = arith.constant 0 : i32
    %c0_i32_0 = arith.constant 0 : i32
    %c0_i32_1 = arith.constant 0 : i32
    return %c0_i32, %c0_i32_0 : i32, i32
  }
  func.func @transform_4(%arg0: i32, %arg1: i32) -> (i32, i32) {
    %c0_i32 = arith.constant 0 : i32
    %c0_i32_0 = arith.constant 0 : i32
    %c0_i32_1 = arith.constant 0 : i32
    return %c0_i32, %c0_i32_0 : i32, i32
  }
  func.func @transform_5(%arg0: i32, %arg1: i32) -> (i32, i32) {
    %c0_i32 = arith.constant 0 : i32
    %c0_i32_0 = arith.constant 0 : i32
    %c0_i32_1 = arith.constant 0 : i32
    return %c0_i32, %c0_i32_0 : i32, i32
  }
  func.func @transform_6(%arg0: i32, %arg1: i32) -> (i32, i32, i32) {
    %c0_i32 = arith.constant 0 : i32
    %c0_i32_0 = arith.constant 0 : i32
    return %arg1, %arg0, %c0_i32 : i32, i32, i32
  }
  func.func @transform_7(%arg0: i32, %arg1: i32) -> (i32, i32) {
    %c0_i32 = arith.constant 0 : i32
    %c0_i32_0 = arith.constant 0 : i32
    return %arg0, %c0_i32 : i32, i32
  }
}

</mosaic_0001>

<bundles_post_ra>
// kernel: tpu_custom_call.1
= control target key start
LH: loop header
LB: loop body
LE: loop exit
PB: predicated region body
PF: predicated region fallthrough
CT: control target
= control target key end

     0   :  { %13 = vsyncpa [#allocation5], 0  ;;  %s659_s0 = inlined_call_operand.hbm [shape: f32[8,2,32], index: 0, kind: input, shape index: {}]   ;;  %s660_s1 = inlined_call_operand.hbm [shape: f32[2,32], index: 1, kind: input, shape index: {}]   ;;  %s661_s2 = inlined_call_operand.hbm [shape: f32[32,96], index: 2, kind: input, shape index: {}]   ;;  %s662_s3 = inlined_call_operand.hbm [shape: f32[32,96], index: 3, kind: input, shape index: {}]   ;;  %s663_s4 = inlined_call_operand.vmem [shape: f32[1,96], index: 4, kind: input, shape index: {}]   ;;  %s664_s5 = inlined_call_operand.vmem [shape: f32[1,32], index: 5, kind: input, shape index: {}]   ;;  %s665_s6 = inlined_call_operand.hbm [shape: f32[8,2,32], index: 6, kind: output, shape index: {0}]   ;;  %s666_s7 = inlined_call_operand.hbm [shape: f32[2,32], index: 7, kind: output, shape index: {1}]  }
   0x1   :  { %14 = vsyncpa [#allocation8], 0 }
   0x2   :  { %15 = vsyncpa [#allocation11], 0 }
   0x3   :  { %16 = vsyncpa [#allocation6], 0  ;;  %s36_s26 = sshll.u32 %s660_s1, 4  ;;  %s37_s26 = int_to_ptr.hbm [resolvable:$true] %s36_s26 }
   0x4   :  { %17 = vsyncpa [#allocation14], 0  ;;  %s533_s27 = smov [#allocation7]   ;;  %s22_s8 = sshll.u32 %s659_s0, 4  ;;  %s23_s8 = int_to_ptr.hbm [resolvable:$true] %s22_s8 }
   0x5   :  { %s38_s28 = sshll.u32 %s533_s27, 4  ;;  %s534_s9 = smov [#allocation4]   ;;  %s39_s28 = int_to_ptr.vmem [resolvable:$true] %s38_s28 }
   0x6   :  { %41 = dma.hbm_to_vmem [thread:$0]  %s37_s26, 32, %s39_s28, [#allocation8]  }
   0x7   :  { %s24_s10 = sshll.u32 %s534_s9, 4  ;;  %s535_s11 = smov 32   ;;  %s25_s10 = int_to_ptr.vmem [resolvable:$true] %s24_s10 }
   0x8   :  { %s536_s12 = smov 2   ;;  %s46_s14 = sshll.u32 %s661_s2, 4  ;;  %s47_s14 = int_to_ptr.hbm [resolvable:$true] %s46_s14 }
   0x9   :  { %30 = dma.hbm_to_vmem [thread:$0]  %s23_s8, 256, %s25_s10, [#allocation5], %s535_s11, %s535_s11, %s536_s12  }
   0xa   :  { %s537_s15 = smov [#allocation9]   ;;  %s59_s18 = sshll.u32 %s662_s3, 4  ;;  %s60_s18 = int_to_ptr.hbm [resolvable:$true] %s59_s18 }
   0xb   :  { %s48_s16 = sshll.u32 %s537_s15, 4  ;;  %s538_s19 = smov 128   ;;  %s49_s16 = int_to_ptr.vmem [resolvable:$true] %s48_s16 }
   0xc   :  { %s539_s20 = smov 8   ;;  %s540_s21 = smov [#allocation10]  }
   0xd   :  { %54 = dma.hbm_to_vmem [thread:$0]  %s47_s14, 512, %s49_s16, [#allocation8], %s538_s19, %s538_s19, %s539_s20  }
   0xe   :  { %s61_s22 = sshll.u32 %s540_s21, 4  ;;  %s62_s22 = int_to_ptr.vmem [resolvable:$true] %s61_s22 }
   0xf   :  { %67 = dma.hbm_to_vmem [thread:$0]  %s60_s18, 512, %s62_s22, [#allocation11], %s538_s19, %s538_s19, %s539_s20  }
  0x10   :  { %515 = dma.done.wait [#allocation5], 256  }
  0x11   :  { %516 = vsyncadd [#allocation5], 4294967040 }
  0x12   :  { %517 = dma.done.wait [#allocation8], 544  }
  0x13   :  { %518 = vsyncadd [#allocation8], 4294966752 }
  0x14   :  { %519 = dma.done.wait [#allocation11], 512  }
  0x15   :  { %520 = vsyncadd [#allocation11], 4294966784  ;;  %vm93_vm0 = vcmask 254976   ;;  %v92_v0 = vld [vmem:[#allocation7] sm:$0x3]  ;;  %v600_v1 = vld [vmem:[#allocation10] sm:$0xff] }
  0x16   :  { %v602_v2 = vld [vmem:[#allocation10 + $0x8] sm:$0xff]  ;;  %94 = vst.msk [vmem:[#allocation2] sm:$0x3] %vm93_vm0, %v92_v0  ;;  %v605_v3 = vld [vmem:[#allocation10 + $0x10] sm:$0xff]  ;;  %v607_v4 = vld [vmem:[#allocation10 + $0x18] sm:$0xff]  ;;  %vm136_vm1 = vcmask 261120  }
  0x17   :  { %v612_v5 = vld [vmem:[%s664_s5] sm:$0x1]  ;;  %v106_v6 = vld [vmem:[#allocation9 + $0x18] sm:$0xff]  ;;  %v104_v8 = vld [vmem:[#allocation9 + $0x8] sm:$0xff]  ;;  %vm178_vm2 = vcmask 779264  }
  0x18   :  { %v105_v7 = vld [vmem:[#allocation9 + $0x10] sm:$0xff]  ;;  %153 = vmatpush.msra.mxu0 %v106_v6  ;;  %326 = vmatpush.msra.mxu1 %v106_v6  ;;  %v95_v9 = vld [vmem:[#allocation4] sm:$0x3]  ;;  %v103_v14 = vld [vmem:[#allocation9] sm:$0xff] }
  0x19   :  { %v96_v10 = vld [vmem:[#allocation4 + $0x2] sm:$0x3]  ;;  %v97_v11 = vld [vmem:[#allocation4 + $0x4] sm:$0x3]  ;;  %v98_v12 = vld [vmem:[#allocation4 + $0x6] sm:$0x3] }
  0x1a   :  { %119 = vst [vmem:[#allocation1] ss:$4 sm:$0xff] %v95_v9  ;;  %154 = vmatpush.msra.mxu0 %v105_v7  ;;  %327 = vmatpush.msra.mxu1 %v105_v7  ;;  %v99_v13 = vld [vmem:[#allocation4 + $0x8] sm:$0x3]  ;;  %v100_v15 = vld [vmem:[#allocation4 + $0xa] sm:$0x3] }
  0x1b   :  { %121 = vst [vmem:[#allocation1 + $0x1] ss:$4 sm:$0xff] %v96_v10  ;;  %v101_v16 = vld [vmem:[#allocation4 + $0xc] sm:$0x3]  ;;  %v102_v18 = vld [vmem:[#allocation4 + $0xe] sm:$0x3] }
  0x1c   :  { %123 = vst [vmem:[#allocation1 + $0x2] ss:$4 sm:$0xff] %v97_v11  ;;  %155 = vmatpush.msra.mxu0 %v104_v8  ;;  %328 = vmatpush.msra.mxu1 %v104_v8  ;;  %v358_v21 = vld [vmem:[%s663_s4] ss:$0 sm:$0xff]  ;;  %s627_s4 = smov 0  }
  0x1d   :  { %125 = vst [vmem:[#allocation1 + $0x3] ss:$4 sm:$0xff] %v98_v12  ;;  %v192_v17 = vld [vmem:[#allocation2] sm:$0x3]  }
  0x1e   :  { %127 = vst [vmem:[#allocation1 + $0x20] ss:$4 sm:$0xff] %v99_v13  ;;  %156 = vmatpush.msra.mxu0 %v103_v14  ;;  %329 = vmatpush.msra.mxu1 %v103_v14  ;;  %v525_v32 = vmov %v192_v17  }
  0x1f   :  { %129 = vst [vmem:[#allocation1 + $0x21] ss:$4 sm:$0xff] %v100_v15 }
  0x20   :  { %131 = vst [vmem:[#allocation1 + $0x22] ss:$4 sm:$0xff] %v101_v16 }
  0x21   :  { %133 = vst [vmem:[#allocation1 + $0x23] ss:$4 sm:$0xff] %v102_v18 }
  0x24   :  { %v134_v19 = vld.sshfl [vmem:[#allocation1] sm:$0xff pattern:$0x73625140] }
  0x25   :  { %322 = vmatmul.msk.f32.vlgmr.msra.gmra.mxu0 %vm136_vm1, %v134_v19 }
  0x28   :  { %v135_v20 = vld.sshfl [vmem:[#allocation1 + $0x20] sm:$0xff pattern:$0x73625140] }
  0x29   :  { %323 = vmatmul.msk.f32.vlgmr.msra.gmra.mxu1 %vm136_vm1, %v135_v20 }
  0xa2   :  { %v158_v22 = vpop.f32.mrf.mxu0 }
  0xa3   :  { %v159_v23 = vadd.f32 %v358_v21, %v158_v22 }
  0xa5   :  { %v166_v24 = vrot.slane %v159_v23, 2  ;;  %v167_v25 = vrot.slane %v159_v23, 4  ;;  %v168_v26 = vrot.slane %v159_v23, 6  ;;  %179 = vst.msk [vmem:[#allocation3] sm:$0x3] %vm178_vm2, %v159_v23 }
  0xa6   :  { %v161_v27 = vpop.f32.mrf.mxu1 }
  0xa7   :  { %180 = vst.msk [vmem:[#allocation3 + $0x2] sm:$0x3] %vm178_vm2, %v166_v24  ;;  %v162_v28 = vadd.f32 %v358_v21, %v161_v27 }
  0xa8   :  { %181 = vst.msk [vmem:[#allocation3 + $0x4] sm:$0x3] %vm178_vm2, %v167_v25 }
  0xa9   :  { %182 = vst.msk [vmem:[#allocation3 + $0x6] sm:$0x3] %vm178_vm2, %v168_v26  ;;  %v169_v29 = vrot.slane %v162_v28, 2  ;;  %v170_v30 = vrot.slane %v162_v28, 4  ;;  %v171_v31 = vrot.slane %v162_v28, 6 }
  0xaa   :  { %183 = vst.msk [vmem:[#allocation3 + $0x8] sm:$0x3] %vm178_vm2, %v162_v28 }
  0xab   :  { %184 = vst.msk [vmem:[#allocation3 + $0xa] sm:$0x3] %vm178_vm2, %v169_v29 }
  0xac   :  { %185 = vst.msk [vmem:[#allocation3 + $0xc] sm:$0x3] %vm178_vm2, %v170_v30 }
  0xad   :  { %186 = vst.msk [vmem:[#allocation3 + $0xe] sm:$0x3] %vm178_vm2, %v171_v31 }
  0xae LB: > { %218 = vmatpush.msra.mxu0 %v607_v4  ;;  %v232_v33 = vperm.slane %v612_v5, 0  ;;  %s541_s24 = smov 64   ;;  %s324_s25 = sshll.u32 %s531_s4, 1  ;;  %s531_s4 = sphi %s627_s4, %s198_s4   ;;  %v527_v32 = vphi %v525_v32, %v526_v32  }
  0xaf   : > { %s201_s26 = scalar_lea.vmem [#allocation3], %s324_s25  ;;  %s542_s27 = smov 32  }
  0xb0   : > { %219 = vmatpush.msra.mxu0 %v605_v3  ;;  %233 = vrot.lane.b32.xlu0 %v232_v33, %s541_s24  ;;  %s267_s28 = scalar_lea.vmem [#allocation12], %s324_s25  ;;  %s198_s4 = sadd.s32 1, %s531_s4  }
  0xb1   : > { %p195_p0 = scmp.ge.s32.totalorder %s198_s4, 8  }
  0xb2   : > { %220 = vmatpush.msra.mxu0 %v602_v2  ;;  %s279_s8 = sshll.u32 (%p195_p0), %s665_s6, 4  ;;  %s543_s9 = smov (%p195_p0), [#allocation12]   ;;  %s280_s8 = int_to_ptr.hbm [resolvable:$true] %s279_s8 }
  0xb3   :  { %s277_s10 = sshll.u32 (%p195_p0), %s543_s9, 4  ;;  %s544_s1 = smov (%p195_p0), [#allocation13]   ;;  %s278_s10 = int_to_ptr.vmem [resolvable:$true] %s277_s10 }
  0xb4   : > { %221 = vmatpush.msra.mxu0 %v600_v1  ;;  %v202_v37 = vld [vmem:[%s201_s26] sm:$0x3]  ;;  %s291_s13 = sshll.u32 (%p195_p0), %s544_s1, 4  ;;  %s293_s16 = sshll.u32 (%p195_p0), %s666_s7, 4  ;;  %s292_s13 = int_to_ptr.vmem [resolvable:$true] %s291_s13  ;;  %s294_s16 = int_to_ptr.hbm [resolvable:$true] %s293_s16 }
  0xb5   : > { %325 = vmatmul.msk.f32.vlgmr.msra.gmra.mxu0 %vm136_vm1, %v527_v32 }
 0x122   : > { %v234_v34 = vpop.permute.xlu0 %233 }
 0x132   : > { %v223_v35 = vpop.f32.mrf.mxu0 }
 0x133   : > { %v236_v36 = vadd.f32 %v234_v34, %v223_v35  ;;  %v226_v38 = vadd.f32 %v223_v35, %v202_v37 }
 0x135   : > { %238 = vrot.lane.b32.xlu0 %v236_v36, %s541_s24  ;;  %v227_v39 = vmul.f32 0.5, %v226_v38 }
 0x137   : > { %359 = vtanh.f32 %v227_v39 }
 0x13d   : > { %v360_v40 = vpop.eup %359 }
 0x13e   : > { %v229_v41 = vadd.f32 1.0, %v360_v40 }
 0x140   : > { %v230_v42 = vmul.f32 0.5, %v229_v41 }
 0x1a7   : > { %v239_v43 = vpop.permute.xlu0 %238 }
 0x1a8   : > { %v241_v44 = vmul.f32 %v239_v43, %v230_v42 }
 0x1aa   : > { %243 = vrot.lane.b32.xlu1 %v241_v44, %s541_s24 }
 0x21c   : > { %v244_v45 = vpop.permute.xlu1 %243 }
 0x21d   : > { %v246_v46 = vadd.f32 %v244_v45, %v202_v37 }
 0x21f   : > { %361 = vtanh.f32 %v246_v46 }
 0x225   : > { %v362_v47 = vpop.eup %361 }
 0x226   : > { %249 = vrot.lane.b32.xlu1 %v362_v47, %s541_s24 }
 0x298   : > { %v250_v48 = vpop.permute.xlu1 %249 }
 0x299   : > { %v252_v49 = vsub.f32 %v527_v32, %v250_v48 }
 0x29b   : > { %254 = vrot.lane.b32.xlu2 %v252_v49, %s542_s27 }
 0x2f5   : > { %v255_v50 = vpop.permute.xlu2 %254 }
 0x2f6   : > { %v257_v51 = vmul.f32 %v255_v50, %v230_v42 }
 0x2f8   : > { %259 = vrot.lane.b32.xlu2 %v257_v51, %s542_s27 }
 0x352   : > { %v260_v52 = vpop.permute.xlu2 %259 }
 0x353   : > { %v262_v53 = vadd.f32 %v362_v47, %v260_v52 }
 0x355   : > { %264 = vrot.lane.b32.xlu0 %v262_v53, %s541_s24 }
 0x3c4   :  { %197 = sbr.rel (!%p195_p0) target bundleno = 174 (0xae), region = 88 }
 0x3c7   : > { %v265_v54 = vpop.permute.xlu0 %264  }
 0x3c8   : > { %269 = vst.msk [vmem:[%s267_s28] sm:$0x3] %vm93_vm0, %v265_v54  ;;  %v526_v32 = vmov %v265_v54  }
 0x3c9   :  { %272 = vst.msk [vmem:[#allocation13] sm:$0x3] %vm93_vm0, %v265_v54  ;;  %285 = dma.vmem_to_hbm [thread:$0]  %s278_s10, 256, %s280_s8, [#allocation6], %s535_s11, %s535_s11, %s536_s12  }
 0x3ca   :  { %271 = vst.msk [vmem:[#allocation2] sm:$0x3] %vm93_vm0, %v265_v54  ;;  %296 = dma.vmem_to_hbm [thread:$0]  %s292_s13, 32, %s294_s16, [#allocation14]  }
 0x3cb   :  { %521 = dma.done.wait [#allocation6], 256  }
 0x3cc   :  { %522 = vsyncadd [#allocation6], 4294967040 }
 0x3cd   :  { %523 = dma.done.wait [#allocation14], 32  }
 0x3ce   :  { %524 = vsyncadd [#allocation14], 4294967264 }
 0x3cf   :  { %305 = vsyncpa [#allocation5], 1 }
 0x3d0   :  { %306 = vsyncpa [#allocation8], 1 }
 0x3d1   :  { %307 = vsyncpa [#allocation11], 1 }
 0x3d2   :  { %308 = vsyncpa [#allocation6], 1 }
 0x3d3   :  { %309 = vsyncpa [#allocation14], 1 }

</bundles_post_ra>
